<compile_context>
chip_gen: v7x
topology: tpu7x:2x2x1
jax: 0.10.0
libtpu: 0.0.40
codegen_flags: <defaults>
</compile_context>

<pallas_src>
import functools

import jax
import jax.numpy as jnp
from jax.experimental import pallas as pl
from jax.experimental.pallas import tpu as pltpu


def _shortcut_kernel(x_ref, sel_ref, o_ref, *, bt, cg_in, pad_lo_g, pad_hi_g):
    """One block of `bt` images per grid step.

    x_ref:   (bt * Cg,  k*H*W)    grouped, lane-dense input rows
    sel_ref: (k*H*W, k*Ho*Wo)     0/1 block-diagonal selection matrix (resident)
    o_ref:   (bt, Cout_g, k*Ho*Wo) grouped, lane-dense, zero-padded output
    """
    n = o_ref.shape[2]

    # Single MXU matmul performs the whole strided spatial subsample.
    # sel is 0/1 in x.dtype; f32 accumulation of exactly one nonzero term per
    # output element keeps this bit-exact vs. a gather.
    y = jnp.dot(x_ref[...], sel_ref[...], preferred_element_type=jnp.float32)
    y = y.astype(o_ref.dtype)                     # (bt * Cg, k*Ho*Wo)

    # Zero ONLY the pad channels.
    if pad_lo_g > 0:
        o_ref[:, :pad_lo_g, :] = jnp.zeros((bt, pad_lo_g, n), o_ref.dtype)
    if pad_hi_g > 0:
        o_ref[:, pad_lo_g + cg_in:, :] = jnp.zeros((bt, pad_hi_g, n), o_ref.dtype)

    # Payload: one wide store; the reshape only splits the leading dim.
    o_ref[:, pad_lo_g:pad_lo_g + cg_in, :] = y.reshape(bt, cg_in, n)


def _group_factor(howo, c, pad):
    """Smallest k with k*Ho*Wo >= 128 (lane-dense output stores), provided the
    channel counts stay aligned to the grouped-row boundaries; else 1."""
    if howo >= 128:
        return 1
    k = -(-128 // howo)
    if k >= 1 and c % k == 0 and pad % k == 0:
        return k
    return 1


def _choose_batch_tile(b, cg, coutg, khw, khowo, itemsize):
    """Largest Bt that (a) divides B, (b) keeps the FULL working set of one
    grid step (double-buffered in+out blocks, resident selection matrix, f32
    accumulator and its cast copy) under a budget that fits every generation's
    scoped VMEM, (c) keeps the input block's sublane dim a multiple of 8 (or
    the full extent), and (d) prefers grid >= 2 so both v7x cores get work."""
    budget = 10 * 1024 * 1024
    sel_bytes = khw * khowo * itemsize

    def working_set(bt):
        in_blk = bt * cg * khw * itemsize
        out_blk = bt * coutg * khowo * itemsize
        y_tmp = bt * cg * khowo * (4 + itemsize)      # f32 acc + cast copy
        return 2 * in_blk + 2 * out_blk + 2 * sel_bytes + y_tmp

    def ok(bt):
        if b % bt:
            return False
        if working_set(bt) > budget:
            return False
        first = bt * cg
        return first % 8 == 0 or first == b * cg

    for bt in range(max(1, b // 2), 0, -1):   # prefer >= 2 grid steps
        if ok(bt):
            return bt
    for bt in range(b, 0, -1):                # fall back (tiny B*C cases)
        if ok(bt):
            return bt
    return 1  # TODO(synk): tile over channels/space if a single image overflows


def lambda_layer_option_a(x, planes):
    """Pallas equivalent of
    F.pad(x[:, :, ::2, ::2], (0, 0, 0, 0, planes//4, planes//4), 'constant', 0)."""
    B, C, H, W = x.shape
    Ho, Wo = -(-H // 2), -(-W // 2)
    pad = planes // 4
    Cout = C + 2 * pad
    HW, HoWo = H * W, Ho * Wo
    dt = x.dtype
    itemsize = jnp.dtype(dt).itemsize

    # Channel grouping factor for lane-dense output stores.
    k = _group_factor(HoWo, C, pad)
    Cg, Coutg, pad_g = C // k, Cout // k, pad // k
    KHW, KHoWo = k * HW, k * HoWo

    Bt = _choose_batch_tile(B, Cg, Coutg, KHW, KHoWo, itemsize)
    grid = (B // Bt,)

    # 0/1 block-diagonal selection matrix, built once in x.dtype (pure shape
    # function of the op -> constant-folded under jit), DMA'd once as a
    # resident input:  sel[a*HW + r, b*HoWo + q] = (a == b) & (r == 2*W*qh + 2*qw).
    R = jnp.arange(KHW, dtype=jnp.int32)[:, None]
    Q = jnp.arange(KHoWo, dtype=jnp.int32)[None, :]
    a_blk, r = R // HW, R % HW
    b_blk, q = Q // HoWo, Q % HoWo
    src = 2 * W * (q // Wo) + 2 * (q % Wo)
    sel = ((a_blk == b_blk) & (r == src)).astype(dt)

    # Lane-dense grouped views (free reshapes of contiguous NCHW memory).
    x_flat = x.reshape(B * Cg, KHW)

    kernel = functools.partial(
        _shortcut_kernel, bt=Bt, cg_in=Cg, pad_lo_g=pad_g,
        pad_hi_g=Coutg - pad_g - Cg)

    out_flat = pl.pallas_call(
        kernel,
        out_shape=jax.ShapeDtypeStruct((B, Coutg, KHoWo), dt),
        grid=grid,
        in_specs=[
            pl.BlockSpec((Bt * Cg, KHW), lambda i: (i, 0)),
            pl.BlockSpec((KHW, KHoWo), lambda i: (0, 0)),   # resident across grid
        ],
        out_specs=pl.BlockSpec((Bt, Coutg, KHoWo), lambda i: (i, 0, 0)),
        compiler_params=pltpu.CompilerParams(
            dimension_semantics=("parallel",),
            vmem_limit_bytes=32 * 1024 * 1024),
        cost_estimate=pl.CostEstimate(
            flops=2 * B * Cg * KHW * KHoWo,
            transcendentals=0,
            bytes_accessed=(B * Cg * KHW + B * Coutg * KHoWo + KHW * KHoWo)
            * itemsize),
    )(x_flat, sel)

    return out_flat.reshape(B, Cout, Ho, Wo)


def _reference(x, planes):
    pad = planes // 4
    return jnp.pad(x[:, :, ::2, ::2], ((0, 0), (pad, pad), (0, 0), (0, 0)),
                   mode="constant")


if __name__ == "__main__":
    key = jax.random.PRNGKey(0)
    k1, k2 = jax.random.split(key)

    # Primary test: small option-A shortcut shape (exercises the k=2 grouped,
    # lane-dense output path since Ho*Wo = 64 < 128).
    B, C, H, W = 2, 4, 16, 16
    planes = 2 * C
    x = jax.random.normal(k1, (B, C, H, W), dtype=jnp.float32)
    out = jax.block_until_ready(lambda_layer_option_a(x, planes))
    ref = _reference(x, planes)
    assert out.shape == ref.shape, (out.shape, ref.shape)
    assert jnp.allclose(out, ref, atol=1e-6), "mismatch vs reference (grouped path)"

    # Secondary test: larger spatial map (Ho*Wo >= 128 -> ungrouped k=1 path,
    # grid of 2 parallel steps).
    B2, C2, H2, W2 = 2, 8, 24, 24
    planes2 = 2 * C2
    x2 = jax.random.normal(k2, (B2, C2, H2, W2), dtype=jnp.float32)
    out2 = jax.block_until_ready(lambda_layer_option_a(x2, planes2))
    ref2 = _reference(x2, planes2)
    assert out2.shape == ref2.shape, (out2.shape, ref2.shape)
    assert jnp.allclose(out2, ref2, atol=1e-6), "mismatch vs reference (k=1 path)"

    print("KERNEL_OK")
</pallas_src>

<mosaic_0001>
module attributes {stable_mosaic.version = 11 : i64} {
  func.func @_shortcut_kernel(%arg0: i32, %arg1: memref<4x512xf32, #tpu.memory_space<vmem>>, %arg2: memref<512x128xf32, #tpu.memory_space<vmem>>, %arg3: memref<2x4x128xf32, #tpu.memory_space<vmem>>) attributes {dimension_semantics = [#tpu.dimension_semantics<parallel>], iteration_bounds = array<i64: 1>, scalar_prefetch = 0 : i64, scratch_operands = 0 : i64, tpu.core_type = #tpu.core_type<tc>, window_params = [{transform_indices = @transform_0, window_bounds = array<i64: 4, 512>}, {pipeline_mode = #tpu.pipeline_mode<synchronous>, transform_indices = @transform_1, window_bounds = array<i64: 512, 128>}, {transform_indices = @transform_2, window_bounds = array<i64: 2, 4, 128>}]} {
    %c0 = arith.constant 0 : index
    %c0_0 = arith.constant 0 : index
    %0 = vector.load %arg1[%c0, %c0_0] : memref<4x512xf32, #tpu.memory_space<vmem>>, vector<4x512xf32>
    %c0_1 = arith.constant 0 : index
    %c0_2 = arith.constant 0 : index
    %1 = vector.load %arg2[%c0_1, %c0_2] : memref<512x128xf32, #tpu.memory_space<vmem>>, vector<512x128xf32>
    %cst = arith.constant dense<0.000000e+00> : vector<4x128xf32>
    %2 = tpu.matmul %0, %1, %cst {dimension_numbers = #tpu.dot_dimension_numbers<[1], [0], [0], [1], [0, 0, 1, 1], [], []>} : vector<4x512xf32>, vector<512x128xf32>, vector<4x128xf32> -> vector<4x128xf32>
    %cst_3 = arith.constant 0.000000e+00 : f32
    %3 = vector.broadcast %cst_3 : f32 to vector<2x1x128xf32>
    %c0_4 = arith.constant 0 : index
    %c0_5 = arith.constant 0 : index
    %c0_6 = arith.constant 0 : index
    %4 = vector.load %arg3[%c0_4, %c0_5, %c0_6] : memref<2x4x128xf32, #tpu.memory_space<vmem>>, vector<2x1x128xf32>
    tpu.vector_store %arg3[%c0_4, %c0_5, %c0_6], %3 {strides = array<i32>} : memref<2x4x128xf32, #tpu.memory_space<vmem>>, vector<2x1x128xf32>,
    %cst_7 = arith.constant 0.000000e+00 : f32
    %5 = vector.broadcast %cst_7 : f32 to vector<2x1x128xf32>
    %c0_8 = arith.constant 0 : index
    %c3 = arith.constant 3 : index
    %c0_9 = arith.constant 0 : index
    %6 = vector.load %arg3[%c0_8, %c3, %c0_9] : memref<2x4x128xf32, #tpu.memory_space<vmem>>, vector<2x1x128xf32>
    tpu.vector_store %arg3[%c0_8, %c3, %c0_9], %5 {strides = array<i32>} : memref<2x4x128xf32, #tpu.memory_space<vmem>>, vector<2x1x128xf32>,
    %7 = vector.shape_cast %2 : vector<4x128xf32> to vector<2x2x128xf32>
    %c0_10 = arith.constant 0 : index
    %c1 = arith.constant 1 : index
    %c0_11 = arith.constant 0 : index
    %8 = vector.load %arg3[%c0_10, %c1, %c0_11] : memref<2x4x128xf32, #tpu.memory_space<vmem>>, vector<2x2x128xf32>
    tpu.vector_store %arg3[%c0_10, %c1, %c0_11], %7 {strides = array<i32>} : memref<2x4x128xf32, #tpu.memory_space<vmem>>, vector<2x2x128xf32>,
    return
  }
  func.func @transform_0(%arg0: i32) -> (i32, i32) {
    %c0_i32 = arith.constant 0 : i32
    %c0_i32_0 = arith.constant 0 : i32
    return %arg0, %c0_i32 : i32, i32
  }
  func.func @transform_1(%arg0: i32) -> (i32, i32) {
    %c0_i32 = arith.constant 0 : i32
    %c0_i32_0 = arith.constant 0 : i32
    %c0_i32_1 = arith.constant 0 : i32
    return %c0_i32, %c0_i32_0 : i32, i32
  }
  func.func @transform_2(%arg0: i32) -> (i32, i32, i32) {
    %c0_i32 = arith.constant 0 : i32
    %c0_i32_0 = arith.constant 0 : i32
    %c0_i32_1 = arith.constant 0 : i32
    return %arg0, %c0_i32, %c0_i32_0 : i32, i32, i32
  }
}

</mosaic_0001>

<bundles_post_ra>
// kernel: tpu_custom_call.1
= control target key start
LH: loop header
LB: loop body
LE: loop exit
PB: predicated region body
PF: predicated region fallthrough
CT: control target
= control target key end

     0   :  { %7 = vsyncpa [#allocation3], 0  ;;  %s570_s0 = inlined_call_operand.hbm [shape: f32[4,512], index: 0, kind: input, shape index: {}]   ;;  %s571_s1 = inlined_call_operand.hbm [shape: f32[512,128], index: 1, kind: input, shape index: {}]   ;;  %s572_s2 = inlined_call_operand.hbm [shape: f32[2,4,128], index: 2, kind: output, shape index: {}]  }
   0x1   :  { %8 = vsyncpa [#allocation6], 0 }
   0x2   :  { %9 = vsyncpa [#allocation4], 0  ;;  %s503_s9 = smov [#allocation2]   ;;  %s504_s11 = smov [#allocation5]  }
   0x3   :  { %s16_s10 = sshll.u32 %s503_s9, 4  ;;  %s25_s12 = sshll.u32 %s504_s11, 4  ;;  %s17_s10 = int_to_ptr.vmem [resolvable:$true] %s16_s10  ;;  %s527_s12 = int_to_ptr.vmem [resolvable:$true] %s25_s12 }
   0x4   :  { %s431_s15 = scalar_lea.hbm %s570_s0, 256 }
   0x5   :  { %p432_p0 = scmp.ne.s32.totalorder %s570_s0, %s431_s15  ;;  %p435_p1 = scmp.lt.u32.totalorder %s431_s15, %s570_s0 }
   0x7   :  { %p437_p2 = pnand %p435_p1, %p432_p0 }
   0x9   :  { %440 = shalt.err (!%p437_p2)
}
   0xa   :  { %s441_s20 = scalar_lea.vmem %s17_s10, 256  ;;  %p446_p4 = scmp.lt.s32.totalorder %s17_s10, %s17_s10 }
   0xb   :  { %p442_p3 = scmp.ne.s32.totalorder %s17_s10, %s441_s20  ;;  %p447_p5 = scmp.lt.s32.totalorder %s441_s20, %s441_s20 }
   0xd   :  { %p448_p6 = por %p447_p5, %p446_p4 }
   0xf   :  { %p449_p7 = pnand %p448_p6, %p442_p3 }
  0x11   :  { %452 = shalt.err (!%p449_p7)
}
  0x12   :  { %19 = dma.hbm_to_vmem [thread:$0]  %s570_s0, 256, %s17_s10, [#allocation3]  }
  0x13   :  { %s453_s25 = scalar_lea.hbm %s571_s1, 8192 }
  0x14   :  { %p454_p8 = scmp.ne.s32.totalorder %s571_s1, %s453_s25  ;;  %p457_p9 = scmp.lt.u32.totalorder %s453_s25, %s571_s1 }
  0x16   :  { %p459_p10 = pnand %p457_p9, %p454_p8 }
  0x18   :  { %462 = shalt.err (!%p459_p10)
}
  0x19   :  { %s463_s30 = scalar_lea.vmem %s527_s12, 8192  ;;  %p468_p12 = scmp.lt.s32.totalorder %s527_s12, %s527_s12 }
  0x1a   :  { %p464_p11 = scmp.ne.s32.totalorder %s527_s12, %s463_s30  ;;  %p469_p13 = scmp.lt.s32.totalorder %s463_s30, %s463_s30 }
  0x1c   :  { %p470_p0 = por %p469_p13, %p468_p12 }
  0x1e   :  { %p471_p1 = pnand %p470_p0, %p464_p11 }
  0x20   :  { %474 = shalt.err (!%p471_p1)
}
  0x21   :  { %s505_s0 = smov 128   ;;  %s506_s3 = smov 8  }
  0x22   :  { %31 = dma.hbm_to_vmem [thread:$0]  %s571_s1, 8192, %s527_s12, [#allocation6], %s505_s0, %s505_s0, %s506_s3  }
  0x23   :  { %497 = dma.done.wait [#allocation3], 256  }
  0x24   :  { %498 = vsyncadd [#allocation3], 4294967040 }
  0x25   :  { %499 = dma.done.wait [#allocation6], 8192  }
  0x26   :  { %500 = vsyncadd [#allocation6], 4294959104  ;;  %v56_v0 = vld [vmem:[#allocation5 + $0x80] sm:$0xff]  ;;  %v57_v1 = vld [vmem:[#allocation5 + $0x88] sm:$0xff]  ;;  %s509_s1 = smov [#allocation7]  }
  0x27   :  { %v88_v2 = vld [vmem:[#allocation5 + $0x180] sm:$0xff]  ;;  %v356_v3 = vpack.c.bf16 %v57_v1, %v56_v0  ;;  %v89_v4 = vld [vmem:[#allocation5 + $0x188] sm:$0xff]  ;;  %v58_v11 = vld [vmem:[#allocation5 + $0x90] sm:$0xff]  ;;  %s272_s6 = sshll.u32 %s509_s1, 4  ;;  %s273_s6 = int_to_ptr.vmem [resolvable:$true] %s272_s6 }
  0x28   :  { %v40_v5 = vld [vmem:[#allocation5] sm:$0xff]  ;;  %v41_v6 = vld [vmem:[#allocation5 + $0x8] sm:$0xff]  ;;  %v388_v7 = vpack.c.bf16 %v89_v4, %v88_v2  ;;  %v59_v13 = vld [vmem:[#allocation5 + $0x98] sm:$0xff]  ;;  %s475_s7 = scalar_lea.vmem %s273_s6, 128  ;;  %p480_p3 = scmp.lt.s32.totalorder %s273_s6, %s273_s6 }
  0x29   :  { %v358_v8 = vpack.c.bf16 %v41_v6, %v40_v5  ;;  %v72_v9 = vld [vmem:[#allocation5 + $0x100] sm:$0xff]  ;;  %v73_v10 = vld [vmem:[#allocation5 + $0x108] sm:$0xff]  ;;  %357 = vmatprep.subr.bf16.mxu0 %v356_v3  ;;  %v90_v14 = vld [vmem:[#allocation5 + $0x190] sm:$0xff]  ;;  %v360_v16 = vpack.c.bf16 %v59_v13, %v58_v11  ;;  %p476_p2 = scmp.ne.s32.totalorder %s273_s6, %s475_s7  ;;  %p481_p4 = scmp.lt.s32.totalorder %s475_s7, %s475_s7 }
  0x2a   :  { %v390_v12 = vpack.c.bf16 %v73_v10, %v72_v9  ;;  %v91_v15 = vld [vmem:[#allocation5 + $0x198] sm:$0xff]  ;;  %389 = vmatprep.subr.bf16.mxu1 %v388_v7  ;;  %v42_v18 = vld [vmem:[#allocation5 + $0x10] sm:$0xff]  ;;  %v60_v23 = vld [vmem:[#allocation5 + $0xa0] sm:$0xff] }
  0x2b   :  { %359 = vmatpush3.bf16.msra.mxu0 %v358_v8  ;;  %v392_v17 = vpack.c.bf16 %v91_v15, %v90_v14  ;;  %v43_v19 = vld [vmem:[#allocation5 + $0x18] sm:$0xff]  ;;  %v74_v20 = vld [vmem:[#allocation5 + $0x110] sm:$0xff]  ;;  %v61_v24 = vld [vmem:[#allocation5 + $0xa8] sm:$0xff]  ;;  %p482_p5 = por %p481_p4, %p480_p3 }
  0x2c   :  { %391 = vmatpush3.bf16.msra.mxu1 %v390_v12  ;;  %v362_v21 = vpack.c.bf16 %v43_v19, %v42_v18  ;;  %v75_v22 = vld [vmem:[#allocation5 + $0x118] sm:$0xff]  ;;  %361 = vmatprep.subr.bf16.mxu0 %v360_v16  ;;  %v364_v26 = vpack.c.bf16 %v61_v24, %v60_v23  ;;  %v92_v27 = vld [vmem:[#allocation5 + $0x1a0] sm:$0xff]  ;;  %v93_v28 = vld [vmem:[#allocation5 + $0x1a8] sm:$0xff] }
  0x2d   :  { %393 = vmatprep.subr.bf16.mxu1 %v392_v17  ;;  %v394_v25 = vpack.c.bf16 %v75_v22, %v74_v20  ;;  %v44_v29 = vld [vmem:[#allocation5 + $0x20] sm:$0xff]  ;;  %v396_v30 = vpack.c.bf16 %v93_v28, %v92_v27  ;;  %v45_v31 = vld [vmem:[#allocation5 + $0x28] sm:$0xff]  ;;  %v62_v35 = vld [vmem:[#allocation5 + $0xb0] sm:$0xff]  ;;  %p483_p6 = pnand %p482_p5, %p476_p2 }
  0x2e   :  { %v76_v32 = vld [vmem:[#allocation5 + $0x120] sm:$0xff]  ;;  %v77_v33 = vld [vmem:[#allocation5 + $0x128] sm:$0xff]  ;;  %v366_v34 = vpack.c.bf16 %v45_v31, %v44_v29  ;;  %v63_v36 = vld [vmem:[#allocation5 + $0xb8] sm:$0xff] }
  0x2f   :  { %363 = vmatpush3.bf16.msra.mxu0 %v362_v21  ;;  %v94_v37 = vld [vmem:[#allocation5 + $0x1b0] sm:$0xff]  ;;  %v398_v38 = vpack.c.bf16 %v77_v33, %v76_v32  ;;  %v368_v39 = vpack.c.bf16 %v63_v36, %v62_v35  ;;  %v95_v40 = vld [vmem:[#allocation5 + $0x1b8] sm:$0xff]  ;;  %v64_v46 = vld [vmem:[#allocation5 + $0xc0] sm:$0xff]  ;;  %v507_v36 = vmov 0.0  }
  0x30   :  { %395 = vmatpush3.bf16.msra.mxu1 %v394_v25  ;;  %365 = vmatprep.subr.bf16.mxu0 %v364_v26  ;;  %v46_v41 = vld [vmem:[#allocation5 + $0x30] sm:$0xff]  ;;  %v47_v42 = vld [vmem:[#allocation5 + $0x38] sm:$0xff]  ;;  %v400_v43 = vpack.c.bf16 %v95_v40, %v94_v37  ;;  %v65_v47 = vld [vmem:[#allocation5 + $0xc8] sm:$0xff]  ;;  %250 = vst [vmem:[#allocation7] sm:$0x1] %v507_v36 }
  0x31   :  { %397 = vmatprep.subr.bf16.mxu1 %v396_v30  ;;  %v78_v44 = vld [vmem:[#allocation5 + $0x130] sm:$0xff]  ;;  %v79_v45 = vld [vmem:[#allocation5 + $0x138] sm:$0xff]  ;;  %v96_v48 = vld [vmem:[#allocation5 + $0x1c0] sm:$0xff]  ;;  %v370_v50 = vpack.c.bf16 %v47_v42, %v46_v41  ;;  %v372_v52 = vpack.c.bf16 %v65_v47, %v64_v46  ;;  %251 = vst [vmem:[#allocation7 + $0x4] sm:$0x1] %v507_v36 }
  0x32   :  { %v97_v49 = vld [vmem:[#allocation5 + $0x1c8] sm:$0xff]  ;;  %v402_v51 = vpack.c.bf16 %v79_v45, %v78_v44  ;;  %v48_v53 = vld [vmem:[#allocation5 + $0x40] sm:$0xff]  ;;  %v66_v58 = vld [vmem:[#allocation5 + $0xd0] sm:$0xff]  ;;  %252 = vst [vmem:[#allocation7 + $0x3] sm:$0x1] %v507_v36 }
  0x33   :  { %367 = vmatpush3.bf16.msra.mxu0 %v366_v34  ;;  %v49_v54 = vld [vmem:[#allocation5 + $0x48] sm:$0xff]  ;;  %v80_v55 = vld [vmem:[#allocation5 + $0x140] sm:$0xff]  ;;  %v404_v56 = vpack.c.bf16 %v97_v49, %v96_v48  ;;  %v67_v59 = vld [vmem:[#allocation5 + $0xd8] sm:$0xff]  ;;  %253 = vst [vmem:[#allocation7 + $0x7] sm:$0x1] %v507_v36 }
  0x34   :  { %399 = vmatpush3.bf16.msra.mxu1 %v398_v38  ;;  %369 = vmatprep.subr.bf16.mxu0 %v368_v39  ;;  %v81_v57 = vld [vmem:[#allocation5 + $0x148] sm:$0xff]  ;;  %v98_v60 = vld [vmem:[#allocation5 + $0x1d0] sm:$0xff]  ;;  %v99_v61 = vld [vmem:[#allocation5 + $0x1d8] sm:$0xff]  ;;  %v374_v62 = vpack.c.bf16 %v49_v54, %v48_v53  ;;  %v376_v0 = vpack.c.bf16 %v67_v59, %v66_v58  ;;  %v508_v37 = vmov 1983009808   ;;  %v258_v39 = vlaneseq }
  0x35   :  { %401 = vmatprep.subr.bf16.mxu1 %v400_v43  ;;  %v406_v63 = vpack.c.bf16 %v81_v57, %v80_v55  ;;  %v50_v1 = vld [vmem:[#allocation5 + $0x50] sm:$0xff]  ;;  %v51_v2 = vld [vmem:[#allocation5 + $0x58] sm:$0xff]  ;;  %v408_v4 = vpack.c.bf16 %v99_v61, %v98_v60  ;;  %v68_v6 = vld [vmem:[#allocation5 + $0xe0] sm:$0xff]  ;;  %v256_v38 = vunpack.c.l.s4 %v508_v37 }
  0x36   :  { %v82_v3 = vld [vmem:[#allocation5 + $0x150] sm:$0xff]  ;;  %v83_v5 = vld [vmem:[#allocation5 + $0x158] sm:$0xff]  ;;  %v69_v7 = vld [vmem:[#allocation5 + $0xe8] sm:$0xff]  ;;  %v378_v10 = vpack.c.bf16 %v51_v2, %v50_v1  ;;  %v259_v41 = vshrl.u32 %v258_v39, 7 }
  0x37   :  { %371 = vmatpush3.bf16.msra.mxu0 %v370_v50  ;;  %v100_v8 = vld [vmem:[#allocation5 + $0x1e0] sm:$0xff]  ;;  %v101_v9 = vld [vmem:[#allocation5 + $0x1e8] sm:$0xff]  ;;  %v410_v13 = vpack.c.bf16 %v83_v5, %v82_v3  ;;  %v380_v14 = vpack.c.bf16 %v69_v7, %v68_v6  ;;  %v38_v16 = vld [vmem:[#allocation2] sm:$0xff]  ;;  %v257_v40 = vunpack.c.0.s8 %v256_v38 }
  0x38   :  { %403 = vmatpush3.bf16.msra.mxu1 %v402_v51  ;;  %373 = vmatprep.subr.bf16.mxu0 %v372_v52  ;;  %v52_v11 = vld [vmem:[#allocation5 + $0x60] sm:$0xff]  ;;  %v53_v12 = vld [vmem:[#allocation5 + $0x68] sm:$0xff]  ;;  %v39_v17 = vld [vmem:[#allocation2 + $0x8] sm:$0xff]  ;;  %v412_v18 = vpack.c.bf16 %v101_v9, %v100_v8  ;;  %v106_v22 = vcombine.high %v38_v16, %v38_v16 }
  0x39   :  { %405 = vmatprep.subr.bf16.mxu1 %v404_v56  ;;  %v84_v15 = vld [vmem:[#allocation5 + $0x160] sm:$0xff]  ;;  %v85_v19 = vld [vmem:[#allocation5 + $0x168] sm:$0xff]  ;;  %v70_v20 = vld [vmem:[#allocation5 + $0xf0] sm:$0xff]  ;;  %v107_v23 = vcombine.high %v39_v17, %v39_v17  ;;  %v382_v26 = vpack.c.bf16 %v53_v12, %v52_v11  ;;  %v260_v48 = vsub.s32 %v257_v40, %v259_v41 }
  0x3a   :  { %v71_v21 = vld [vmem:[#allocation5 + $0xf8] sm:$0xff]  ;;  %v102_v24 = vld [vmem:[#allocation5 + $0x1f0] sm:$0xff]  ;;  %174 = vmatprep.mubr.f32.mxu0 %v106_v22  ;;  %v414_v27 = vpack.c.bf16 %v85_v19, %v84_v15 }
  0x3b   :  { %375 = vmatpush3.bf16.msra.mxu0 %v374_v62  ;;  %v103_v25 = vld [vmem:[#allocation5 + $0x1f8] sm:$0xff]  ;;  %v384_v28 = vpack.c.bf16 %v71_v21, %v70_v20  ;;  %v54_v29 = vld [vmem:[#allocation5 + $0x70] sm:$0xff]  ;;  %244 = vmatprep.mubr.f32.mxu1 %v107_v23 }
  0x3c   :  { %407 = vmatpush3.bf16.msra.mxu1 %v406_v63  ;;  %377 = vmatprep.subr.bf16.mxu0 %v376_v0  ;;  %v55_v30 = vld [vmem:[#allocation5 + $0x78] sm:$0xff]  ;;  %v416_v31 = vpack.c.bf16 %v103_v25, %v102_v24  ;;  %v86_v32 = vld [vmem:[#allocation5 + $0x170] sm:$0xff] }
  0x3d   :  { %409 = vmatprep.subr.bf16.mxu1 %v408_v4  ;;  %v87_v33 = vld [vmem:[#allocation5 + $0x178] sm:$0xff]  ;;  %v386_v34 = vpack.c.bf16 %v55_v30, %v54_v29 }
  0x3e   :  { %v418_v35 = vpack.c.bf16 %v87_v33, %v86_v32 }
  0x3f   :  { %379 = vmatpush3.bf16.msra.mxu0 %v378_v10 }
  0x40   :  { %411 = vmatpush3.bf16.msra.mxu1 %v410_v13  ;;  %381 = vmatprep.subr.bf16.mxu0 %v380_v14 }
  0x41   :  { %413 = vmatprep.subr.bf16.mxu1 %v412_v18 }
  0x43   :  { %383 = vmatpush3.bf16.msra.mxu0 %v382_v26 }
  0x44   :  { %415 = vmatpush3.bf16.msra.mxu1 %v414_v27  ;;  %385 = vmatprep.subr.bf16.mxu0 %v384_v28 }
  0x45   :  { %417 = vmatprep.subr.bf16.mxu1 %v416_v31 }
  0x47   :  { %387 = vmatpush3.bf16.msra.mxu0 %v386_v34 }
  0x48   :  { %419 = vmatpush3.bf16.msra.mxu1 %v418_v35 }
  0x4a   :  { %175 = vmatmul.mubr.f32.vlgmr.msra.gmra.mrb[0].mxu0 %v38_v16 }
  0x4b   :  { %245 = vmatmul.mubr.f32.vlgmr.msra.gmra.mrb[0].mxu1 %v39_v17 }
 0x11d   :  { %v318_v42 = vpop.f32.mrb[0].mxu0 }
 0x11e   :  { %v353_v43 = vpop.f32.mrb[0].mxu1  ;;  %v319_v44 = vpop.f32.mrb[1].mxu0 }
 0x11f   :  { %v320_v45 = vadd.f32 %v319_v44, %v318_v42  ;;  %v354_v46 = vpop.f32.mrb[1].mxu1 }
 0x120   :  { %v355_v47 = vadd.f32 %v354_v46, %v353_v43 }
 0x122   :  { %v247_v49 = vadd.f32 %v355_v47, %v320_v45 }
 0x124   :  { %v261_v50 = vrot.slane %v247_v49, %v260_v48  ;;  %285 = vst.sshfl [vmem:[#allocation7 + $0x1] sm:$0x3 pattern:$0x76325410] %v247_v49 }
 0x126   :  { %v262_v51 = vcombine.high %v261_v50, %v261_v50 }
 0x128   :  { %266 = vst [vmem:[#allocation7 + $0x5] sm:$0x3] %v262_v51 }
 0x129   :  { %486 = shalt.err (!%p483_p6)
}
 0x12a   :  { %s487_s10 = scalar_lea.hbm %s572_s2, 128 }
 0x12b   :  { %p488_p7 = scmp.ne.s32.totalorder %s572_s2, %s487_s10  ;;  %p491_p8 = scmp.lt.u32.totalorder %s487_s10, %s572_s2 }
 0x12d   :  { %p493_p9 = pnand %p491_p8, %p488_p7 }
 0x12f   :  { %496 = shalt.err (!%p493_p9)
}
 0x130   :  { %s510_s15 = smov 64   ;;  %s511_s16 = smov 4  }
 0x131   :  { %278 = dma.vmem_to_hbm [thread:$0]  %s273_s6, 128, %s572_s2, [#allocation4], %s510_s15, %s510_s15, %s511_s16  }
 0x132   :  { %501 = dma.done.wait [#allocation4], 128  }
 0x133   :  { %502 = vsyncadd [#allocation4], 4294967168 }
 0x134   :  { %282 = vsyncpa [#allocation3], 1 }
 0x135   :  { %283 = vsyncpa [#allocation6], 1 }
 0x136   :  { %284 = vsyncpa [#allocation4], 1 }

</bundles_post_ra>
